<compile_context>
chip_gen: v6e
topology: v6e:2x2x1
jax: 0.10.0
libtpu: 0.0.40
codegen_flags: <defaults>
</compile_context>

<pallas_src>
import functools
import math

import jax
import jax.numpy as jnp
from jax.experimental import pallas as pl
from jax.experimental.pallas import tpu as pltpu

_LANE = 128      # lane (last-dim) granularity for dense vector stores / MXU N,K
_SUBLANE = 8     # sublane (second-to-last dim) granularity


def _round_up(n, m):
    return ((n + m - 1) // m) * m


def _apply_activation(y, activation):
    if activation == "relu":
        return jnp.maximum(y, 0.0)
    if activation == "tanh":
        return jnp.tanh(y)
    if activation == "sigmoid":
        return jax.nn.sigmoid(y)
    if activation in ("linear", "none"):
        return y
    if activation == "quadratic":
        return y * y
    raise ValueError("Unsupported activation function")


def _fused_mlp_kernel(*refs, n_layers, activation):
    """refs = (x, w0, b0, w1, b1, ..., w_{L-1}, b_{L-1}, out).

    x:  [TB, D0p]          (batch-tile rows, lane-padded features)
    wi: [Dip, D(i+1)p]     (PyTorch [out, in] weights pre-transposed to [in, out])
    bi: [1,  D(i+1)p]
    out:[TB, DLp]
    All layers run back-to-back on the MXU; intermediate activations stay
    on-chip (never written to HBM).
    """
    x_ref = refs[0]
    o_ref = refs[-1]
    wb = refs[1:-1]

    h = x_ref[...]
    for i in range(n_layers):
        w = wb[2 * i][...]
        b = wb[2 * i + 1][...]
        h = jnp.dot(h, w, preferred_element_type=jnp.float32) + b
        if i != n_layers - 1:  # final Linear has no activation (matches nn.Sequential)
            h = _apply_activation(h, activation)
    o_ref[...] = h.astype(o_ref.dtype)


def pad_classifier_params(params):
    """One-time parameter preparation (runs OUTSIDE the per-step forward).

    params = [(W [in, out], b [out]), ...]  (already [in, out] layout)
    Returns a flat tuple (w0p, b0p, w1p, b1p, ...) with lane-padded shapes.
    Padded regions are zero, so they are mathematically inert.
    """
    flat = []
    for w, b in params:
        din, dout = w.shape
        dinp, doutp = _round_up(din, _LANE), _round_up(dout, _LANE)
        wp = jnp.zeros((dinp, doutp), jnp.float32).at[:din, :dout].set(
            w.astype(jnp.float32))
        bp = jnp.zeros((1, doutp), jnp.float32).at[:, :dout].set(
            b.reshape(1, -1).astype(jnp.float32))
        flat += [wp, bp]
    return tuple(flat)


def _fused_classifier(x, flat_params, out_dim, activation_func, batch_tile):
    """Fused forward pass on pre-padded params (see pad_classifier_params)."""
    B, Din = x.shape
    n_layers = len(flat_params) // 2

    # Padded layer widths are encoded in the (static) padded param shapes.
    pdims = [flat_params[0].shape[0]] + [flat_params[2 * i].shape[1]
                                         for i in range(n_layers)]
    Bp = _round_up(max(B, _SUBLANE), _SUBLANE)

    # Zero-pad the input (batch to sublane multiple, features to lane multiple).
    xp = jnp.zeros((Bp, pdims[0]), jnp.float32).at[:B, :Din].set(
        x.astype(jnp.float32))

    kernel = functools.partial(
        _fused_mlp_kernel, n_layers=n_layers, activation=activation_func
    )
    # NOTE: weights here are a few KiB; for scaled-up models keep
    # sum(Dip*Doutp*4) + activation tiles under v7x's 64 MiB VMEM (stream
    # weights per layer or cast to bf16 once widths reach the thousands).
    vmem_limit = 32 * 1024 * 1024  # safe on v5e/v6e/v7x

    tb = _round_up(min(batch_tile, Bp), _SUBLANE)
    if Bp <= tb:
        # Small batch: one grid-less call, every operand a full-array VMEM block.
        vmem_spec = pl.BlockSpec(memory_space=pltpu.MemorySpace.VMEM)
        out = pl.pallas_call(
            kernel,
            out_shape=jax.ShapeDtypeStruct((Bp, pdims[-1]), jnp.float32),
            in_specs=[vmem_spec] * (1 + len(flat_params)),
            out_specs=vmem_spec,
            compiler_params=pltpu.CompilerParams(vmem_limit_bytes=vmem_limit),
        )(xp, *flat_params)
    else:
        # Large batch: tile the batch axis; weights/biases are grid-invariant
        # blocks (constant index_map -> stay resident in VMEM across tiles).
        # The batch axis is "parallel" so v7x can shard it across its 2 TCs.
        Bp2 = _round_up(Bp, tb)
        if Bp2 != Bp:
            xp = jnp.pad(xp, ((0, Bp2 - Bp), (0, 0)))
            Bp = Bp2
        grid = (Bp // tb,)
        in_specs = [pl.BlockSpec((tb, pdims[0]), lambda i: (i, 0))]
        for li in range(n_layers):
            in_specs.append(
                pl.BlockSpec((pdims[li], pdims[li + 1]), lambda i: (0, 0))
            )
            in_specs.append(pl.BlockSpec((1, pdims[li + 1]), lambda i: (0, 0)))
        out = pl.pallas_call(
            kernel,
            out_shape=jax.ShapeDtypeStruct((Bp, pdims[-1]), jnp.float32),
            grid=grid,
            in_specs=in_specs,
            out_specs=pl.BlockSpec((tb, pdims[-1]), lambda i: (i, 0)),
            compiler_params=pltpu.CompilerParams(
                dimension_semantics=("parallel",),
                vmem_limit_bytes=vmem_limit,
            ),
        )(xp, *flat_params)

    return out[:B, :out_dim]


classifier_forward = jax.jit(
    _fused_classifier, static_argnames=("out_dim", "activation_func", "batch_tile")
)


def init_classifier_params(key, input_dim, num_hidden_layers,
                           hidden_layer_width, output_dim):
    """Deterministic PyTorch-style (Kaiming-uniform-ish) Linear init.

    Weights are stored already transposed to [in, out] for the kernel layout.
    Layer structure matches Classifier: Linear(in,h) + act, (H-1) x
    [Linear(h,h) + act], Linear(h,out) with no final activation.
    """
    dims = [input_dim] + [hidden_layer_width] * num_hidden_layers + [output_dim]
    params = []
    for fan_in, fan_out in zip(dims[:-1], dims[1:]):
        key, kw, kb = jax.random.split(key, 3)
        bound = 1.0 / math.sqrt(fan_in)
        w = jax.random.uniform(kw, (fan_in, fan_out), jnp.float32,
                               minval=-bound, maxval=bound)
        b = jax.random.uniform(kb, (fan_out,), jnp.float32,
                               minval=-bound, maxval=bound)
        params.append((w, b))
    return params


def _reference_forward(x, params, activation_func):
    """Pure-JAX reference (same math, no Pallas)."""
    h = x
    for idx, (w, b) in enumerate(params):
        h = h @ w + b
        if idx != len(params) - 1:
            h = _apply_activation(h, activation_func)
    return h


if __name__ == "__main__":
    # Small synthetic config consistent with the module's constructor.
    batch = 8
    input_dim = 16
    num_hidden_layers = 2
    hidden_layer_width = 32
    output_dim = 4
    activation_func = "relu"

    key = jax.random.PRNGKey(0)
    key, kx = jax.random.split(key)
    x = jax.random.normal(kx, (batch, input_dim), jnp.float32)

    params = init_classifier_params(key, input_dim, num_hidden_layers,
                                    hidden_layer_width, output_dim)
    flat_padded = pad_classifier_params(params)   # one-time prep, outside jit

    # Path 1: small batch -> single grid-less fused kernel.
    out = classifier_forward(x, flat_padded, output_dim, activation_func,
                             batch_tile=512)
    out = jax.block_until_ready(out)
    ref = _reference_forward(x, params, activation_func)
    assert out.shape == (batch, output_dim)
    assert jnp.allclose(out, ref, atol=1e-4, rtol=1e-4)

    # Path 2: larger batch -> batch-tiled fused kernel ("parallel" grid axis),
    # exercised with a different activation to cover the epilogue variants.
    key, kx2 = jax.random.split(key)
    x_big = jax.random.normal(kx2, (64, input_dim), jnp.float32)
    out_big = classifier_forward(x_big, flat_padded, output_dim, "tanh",
                                 batch_tile=16)
    out_big = jax.block_until_ready(out_big)
    ref_big = _reference_forward(x_big, params, "tanh")
    assert out_big.shape == (64, output_dim)
    assert jnp.allclose(out_big, ref_big, atol=1e-4, rtol=1e-4)

    print("KERNEL_OK")
</pallas_src>

<mosaic_0001>
module attributes {stable_mosaic.version = 11 : i64} {
  func.func @_fused_mlp_kernel(%arg0: memref<8x128xf32, #tpu.memory_space<vmem>>, %arg1: memref<128x128xf32, #tpu.memory_space<vmem>>, %arg2: memref<1x128xf32, #tpu.memory_space<vmem>>, %arg3: memref<128x128xf32, #tpu.memory_space<vmem>>, %arg4: memref<1x128xf32, #tpu.memory_space<vmem>>, %arg5: memref<128x128xf32, #tpu.memory_space<vmem>>, %arg6: memref<1x128xf32, #tpu.memory_space<vmem>>, %arg7: memref<8x128xf32, #tpu.memory_space<vmem>>) attributes {dimension_semantics = [], scalar_prefetch = 0 : i64, scratch_operands = 0 : i64, tpu.core_type = #tpu.core_type<tc>} {
    %c0 = arith.constant 0 : index
    %c0_0 = arith.constant 0 : index
    %0 = vector.load %arg0[%c0, %c0_0] : memref<8x128xf32, #tpu.memory_space<vmem>>, vector<8x128xf32>
    %c0_1 = arith.constant 0 : index
    %c0_2 = arith.constant 0 : index
    %1 = vector.load %arg1[%c0_1, %c0_2] : memref<128x128xf32, #tpu.memory_space<vmem>>, vector<128x128xf32>
    %c0_3 = arith.constant 0 : index
    %c0_4 = arith.constant 0 : index
    %2 = vector.load %arg2[%c0_3, %c0_4] : memref<1x128xf32, #tpu.memory_space<vmem>>, vector<1x128xf32>
    %cst = arith.constant dense<0.000000e+00> : vector<8x128xf32>
    %3 = tpu.matmul %0, %1, %cst {dimension_numbers = #tpu.dot_dimension_numbers<[1], [0], [0], [1], [0, 0, 1, 1], [], []>} : vector<8x128xf32>, vector<128x128xf32>, vector<8x128xf32> -> vector<8x128xf32>
    %4 = vector.broadcast %2 : vector<1x128xf32> to vector<8x128xf32>
    %5 = arith.addf %3, %4 : vector<8x128xf32>
    %cst_5 = arith.constant 0.000000e+00 : f32
    %6 = vector.broadcast %cst_5 : f32 to vector<8x128xf32>
    %7 = arith.maximumf %5, %6 : vector<8x128xf32>
    %c0_6 = arith.constant 0 : index
    %c0_7 = arith.constant 0 : index
    %8 = vector.load %arg3[%c0_6, %c0_7] : memref<128x128xf32, #tpu.memory_space<vmem>>, vector<128x128xf32>
    %c0_8 = arith.constant 0 : index
    %c0_9 = arith.constant 0 : index
    %9 = vector.load %arg4[%c0_8, %c0_9] : memref<1x128xf32, #tpu.memory_space<vmem>>, vector<1x128xf32>
    %cst_10 = arith.constant dense<0.000000e+00> : vector<8x128xf32>
    %10 = tpu.matmul %7, %8, %cst_10 {dimension_numbers = #tpu.dot_dimension_numbers<[1], [0], [0], [1], [0, 0, 1, 1], [], []>} : vector<8x128xf32>, vector<128x128xf32>, vector<8x128xf32> -> vector<8x128xf32>
    %11 = vector.broadcast %9 : vector<1x128xf32> to vector<8x128xf32>
    %12 = arith.addf %10, %11 : vector<8x128xf32>
    %cst_11 = arith.constant 0.000000e+00 : f32
    %13 = vector.broadcast %cst_11 : f32 to vector<8x128xf32>
    %14 = arith.maximumf %12, %13 : vector<8x128xf32>
    %c0_12 = arith.constant 0 : index
    %c0_13 = arith.constant 0 : index
    %15 = vector.load %arg5[%c0_12, %c0_13] : memref<128x128xf32, #tpu.memory_space<vmem>>, vector<128x128xf32>
    %c0_14 = arith.constant 0 : index
    %c0_15 = arith.constant 0 : index
    %16 = vector.load %arg6[%c0_14, %c0_15] : memref<1x128xf32, #tpu.memory_space<vmem>>, vector<1x128xf32>
    %cst_16 = arith.constant dense<0.000000e+00> : vector<8x128xf32>
    %17 = tpu.matmul %14, %15, %cst_16 {dimension_numbers = #tpu.dot_dimension_numbers<[1], [0], [0], [1], [0, 0, 1, 1], [], []>} : vector<8x128xf32>, vector<128x128xf32>, vector<8x128xf32> -> vector<8x128xf32>
    %18 = vector.broadcast %16 : vector<1x128xf32> to vector<8x128xf32>
    %19 = arith.addf %17, %18 : vector<8x128xf32>
    %c0_17 = arith.constant 0 : index
    %c0_18 = arith.constant 0 : index
    %20 = vector.load %arg7[%c0_17, %c0_18] : memref<8x128xf32, #tpu.memory_space<vmem>>, vector<8x128xf32>
    tpu.vector_store %arg7[%c0_17, %c0_18], %19 {strides = array<i32>} : memref<8x128xf32, #tpu.memory_space<vmem>>, vector<8x128xf32>,
    return
  }
}

</mosaic_0001>

<bundles_post_ra>
// kernel: _fused_classifier.1
= control target key start
LH: loop header
LB: loop body
LE: loop exit
PB: predicated region body
PF: predicated region fallthrough
CT: control target
= control target key end

     0   :  { %12 = vsyncpa [#allocation3], 0  ;;  %s711_s0 = inlined_call_operand.vmem [shape: f32[8,128], index: 0, kind: input, shape index: {}]   ;;  %s712_s1 = inlined_call_operand.hbm [shape: f32[128,128], index: 1, kind: input, shape index: {}]   ;;  %s713_s2 = inlined_call_operand.vmem [shape: f32[1,128], index: 2, kind: input, shape index: {}]   ;;  %s714_s3 = inlined_call_operand.hbm [shape: f32[128,128], index: 3, kind: input, shape index: {}]   ;;  %s715_s4 = inlined_call_operand.vmem [shape: f32[1,128], index: 4, kind: input, shape index: {}]   ;;  %s716_s5 = inlined_call_operand.hbm [shape: f32[128,128], index: 5, kind: input, shape index: {}]   ;;  %s717_s6 = inlined_call_operand.vmem [shape: f32[1,128], index: 6, kind: input, shape index: {}]   ;;  %s718_s7 = inlined_call_operand.vmem [shape: f32[8,128], index: 7, kind: output, shape index: {}]  }
   0x1   :  { %13 = vsyncpa [#allocation5], 0  ;;  %s586_s24 = smov [#allocation4]   ;;  %s587_s26 = smov [#allocation2]  }
   0x2   :  { %s35_s25 = sshll.u32 %s586_s24, 4  ;;  %s21_s27 = sshll.u32 %s587_s26, 4  ;;  %s36_s25 = int_to_ptr.vmem [resolvable:$true] %s35_s25  ;;  %s22_s27 = int_to_ptr.vmem [resolvable:$true] %s21_s27 }
   0x3   :  { %s530_s28 = scalar_lea.vmem %s36_s25, 2048  ;;  %p535_p1 = scmp.lt.s32.totalorder %s36_s25, %s36_s25 }
   0x4   :  { %p531_p0 = scmp.ne.s32.totalorder %s36_s25, %s530_s28  ;;  %p536_p2 = scmp.lt.s32.totalorder %s530_s28, %s530_s28 }
   0x6   :  { %p537_p3 = por %p536_p2, %p535_p1 }
   0x8   :  { %p538_p4 = pnand %p537_p3, %p531_p0 }
   0xa   :  { %541 = shalt.err (!%p538_p4)
}
   0xb   :  { %s588_s29 = smov 128   ;;  %s589_s30 = smov 8  }
   0xc   :  { %41 = dma.hbm_to_vmem [thread:$0]  %s714_s3, 2048, %s36_s25, [#allocation5], %s588_s29, %s588_s29, %s589_s30  }
   0xd   :  { %s550_s10 = scalar_lea.vmem %s22_s27, 2048  ;;  %p555_p6 = scmp.lt.s32.totalorder %s22_s27, %s22_s27 }
   0xe   :  { %p551_p5 = scmp.ne.s32.totalorder %s22_s27, %s550_s10  ;;  %p556_p7 = scmp.lt.s32.totalorder %s550_s10, %s550_s10 }
  0x10   :  { %p557_p8 = por %p556_p7, %p555_p6 }
  0x12   :  { %p558_p9 = pnand %p557_p8, %p551_p5 }
  0x14   :  { %561 = shalt.err (!%p558_p9)
}
  0x15   :  { %27 = dma.hbm_to_vmem [thread:$0]  %s712_s1, 2048, %s22_s27, [#allocation3], %s588_s29, %s588_s29, %s589_s30  }
  0x16   :  { %s590_s13 = smov [#allocation6]  }
  0x17   :  { %s49_s14 = sshll.u32 %s590_s13, 4  ;;  %s50_s14 = int_to_ptr.vmem [resolvable:$true] %s49_s14 }
  0x18   :  { %s570_s15 = scalar_lea.vmem %s50_s14, 2048  ;;  %p575_p11 = scmp.lt.s32.totalorder %s50_s14, %s50_s14 }
  0x19   :  { %p571_p10 = scmp.ne.s32.totalorder %s50_s14, %s570_s15  ;;  %p576_p12 = scmp.lt.s32.totalorder %s570_s15, %s570_s15 }
  0x1b   :  { %p577_p13 = por %p576_p12, %p575_p11 }
  0x1d   :  { %p578_p0 = pnand %p577_p13, %p571_p10 }
  0x1f   :  { %581 = shalt.err (!%p578_p0)
}
  0x20   :  { %55 = dma.hbm_to_vmem [thread:$0]  %s716_s5, 2048, %s50_s14, [#allocation5], %s588_s29, %s588_s29, %s589_s30  }
  0x21   :  { %582 = dma.done.wait [#allocation3], 2048  }
  0x22   :  { %583 = vsyncadd [#allocation3], 4294965248 }
  0x23   :  { %584 = dma.done.wait [#allocation5], 4096  }
  0x24   :  { %585 = vsyncadd [#allocation5], 4294963200  ;;  %v591_v0 = vmov 0.0   ;;  %vm592_vm0 = vmmov 0   ;;  %v83_v1 = vld [vmem:[#allocation2 + $0x78] sm:$0xff]  ;;  %v82_v2 = vld [vmem:[#allocation2 + $0x70] sm:$0xff] }
  0x25   :  { %410 = vmatprep.subr.mxu0 %v591_v0  ;;  %442 = vmatprep.mubr.msk.f32.mxu0 %vm592_vm0, %v591_v0  ;;  %v81_v3 = vld [vmem:[#allocation2 + $0x68] sm:$0xff]  ;;  %v80_v4 = vld [vmem:[#allocation2 + $0x60] sm:$0xff]  ;;  %v177_v5 = vld [vmem:[#allocation4 + $0x78] sm:$0xff] }
  0x26   :  { %445 = vmatprep.subr.mxu1 %v591_v0  ;;  %477 = vmatprep.mubr.msk.f32.mxu1 %vm592_vm0, %v591_v0  ;;  %v79_v6 = vld [vmem:[#allocation2 + $0x58] sm:$0xff]  ;;  %v176_v7 = vld [vmem:[#allocation4 + $0x70] sm:$0xff]  ;;  %v175_v8 = vld [vmem:[#allocation4 + $0x68] sm:$0xff] }
  0x27   :  { %411 = vmatpush3.msra.mxu0 %v83_v1  ;;  %446 = vmatpush3.msra.mxu1 %v177_v5  ;;  %v78_v9 = vld [vmem:[#allocation2 + $0x50] sm:$0xff]  ;;  %v174_v10 = vld [vmem:[#allocation4 + $0x60] sm:$0xff]  ;;  %v77_v11 = vld [vmem:[#allocation2 + $0x48] sm:$0xff] }
  0x28   :  { %412 = vmatprep.subr.mxu0 %v591_v0  ;;  %447 = vmatprep.subr.mxu1 %v591_v0  ;;  %v173_v12 = vld [vmem:[#allocation4 + $0x58] sm:$0xff]  ;;  %v76_v13 = vld [vmem:[#allocation2 + $0x40] sm:$0xff]  ;;  %v172_v14 = vld [vmem:[#allocation4 + $0x50] sm:$0xff] }
  0x29   :  { %413 = vmatpush3.msra.mxu0 %v82_v2  ;;  %448 = vmatpush3.msra.mxu1 %v176_v7  ;;  %v75_v15 = vld [vmem:[#allocation2 + $0x38] sm:$0xff]  ;;  %v171_v16 = vld [vmem:[#allocation4 + $0x48] sm:$0xff]  ;;  %v74_v17 = vld [vmem:[#allocation2 + $0x30] sm:$0xff] }
  0x2a   :  { %414 = vmatprep.subr.mxu0 %v591_v0  ;;  %449 = vmatprep.subr.mxu1 %v591_v0  ;;  %v170_v18 = vld [vmem:[#allocation4 + $0x40] sm:$0xff]  ;;  %v73_v19 = vld [vmem:[#allocation2 + $0x28] sm:$0xff]  ;;  %v169_v20 = vld [vmem:[#allocation4 + $0x38] sm:$0xff] }
  0x2b   :  { %415 = vmatpush3.msra.mxu0 %v81_v3  ;;  %450 = vmatpush3.msra.mxu1 %v175_v8  ;;  %v72_v21 = vld [vmem:[#allocation2 + $0x20] sm:$0xff]  ;;  %v168_v22 = vld [vmem:[#allocation4 + $0x30] sm:$0xff]  ;;  %v71_v23 = vld [vmem:[#allocation2 + $0x18] sm:$0xff] }
  0x2c   :  { %416 = vmatprep.subr.mxu0 %v591_v0  ;;  %451 = vmatprep.subr.mxu1 %v591_v0  ;;  %v167_v24 = vld [vmem:[#allocation4 + $0x28] sm:$0xff]  ;;  %v70_v25 = vld [vmem:[#allocation2 + $0x10] sm:$0xff]  ;;  %v166_v26 = vld [vmem:[#allocation4 + $0x20] sm:$0xff] }
  0x2d   :  { %417 = vmatpush3.msra.mxu0 %v80_v4  ;;  %452 = vmatpush3.msra.mxu1 %v174_v10  ;;  %v69_v27 = vld [vmem:[#allocation2 + $0x8] sm:$0xff]  ;;  %v165_v28 = vld [vmem:[#allocation4 + $0x18] sm:$0xff]  ;;  %v68_v29 = vld [vmem:[#allocation2] sm:$0xff] }
  0x2e   :  { %418 = vmatprep.subr.mxu0 %v591_v0  ;;  %453 = vmatprep.subr.mxu1 %v591_v0  ;;  %v67_v30 = vld [vmem:[%s711_s0] sm:$0xff]  ;;  %v164_v31 = vld [vmem:[#allocation4 + $0x10] sm:$0xff]  ;;  %v163_v32 = vld [vmem:[#allocation4 + $0x8] sm:$0xff] }
  0x2f   :  { %419 = vmatpush3.msra.mxu0 %v79_v6  ;;  %454 = vmatpush3.msra.mxu1 %v173_v12  ;;  %v162_v33 = vld [vmem:[#allocation4] sm:$0xff]  ;;  %v271_v34 = vld [vmem:[#allocation6 + $0x78] sm:$0xff]  ;;  %v270_v35 = vld [vmem:[#allocation6 + $0x70] sm:$0xff] }
  0x30   :  { %420 = vmatprep.subr.mxu0 %v591_v0  ;;  %455 = vmatprep.subr.mxu1 %v591_v0  ;;  %v269_v36 = vld [vmem:[#allocation6 + $0x68] sm:$0xff]  ;;  %v268_v37 = vld [vmem:[#allocation6 + $0x60] sm:$0xff]  ;;  %v267_v38 = vld [vmem:[#allocation6 + $0x58] sm:$0xff] }
  0x31   :  { %421 = vmatpush3.msra.mxu0 %v78_v9  ;;  %456 = vmatpush3.msra.mxu1 %v172_v14  ;;  %v266_v39 = vld [vmem:[#allocation6 + $0x50] sm:$0xff]  ;;  %v265_v40 = vld [vmem:[#allocation6 + $0x48] sm:$0xff]  ;;  %v264_v41 = vld [vmem:[#allocation6 + $0x40] sm:$0xff] }
  0x32   :  { %422 = vmatprep.subr.mxu0 %v591_v0  ;;  %457 = vmatprep.subr.mxu1 %v591_v0  ;;  %v263_v42 = vld [vmem:[#allocation6 + $0x38] sm:$0xff]  ;;  %v262_v43 = vld [vmem:[#allocation6 + $0x30] sm:$0xff]  ;;  %v261_v44 = vld [vmem:[#allocation6 + $0x28] sm:$0xff] }
  0x33   :  { %423 = vmatpush3.msra.mxu0 %v77_v11  ;;  %458 = vmatpush3.msra.mxu1 %v171_v16  ;;  %v260_v45 = vld [vmem:[#allocation6 + $0x20] sm:$0xff]  ;;  %v259_v46 = vld [vmem:[#allocation6 + $0x18] sm:$0xff]  ;;  %v258_v52 = vld [vmem:[#allocation6 + $0x10] sm:$0xff] }
  0x34   :  { %424 = vmatprep.subr.mxu0 %v591_v0  ;;  %459 = vmatprep.subr.mxu1 %v591_v0  ;;  %v356_v47 = vld [vmem:[%s713_s2] ss:$0 sm:$0xff]  ;;  %v257_v53 = vld [vmem:[#allocation6 + $0x8] sm:$0xff] }
  0x35   :  { %425 = vmatpush3.msra.mxu0 %v76_v13  ;;  %460 = vmatpush3.msra.mxu1 %v170_v18  ;;  %v256_v54 = vld [vmem:[#allocation6] sm:$0xff] }
  0x36   :  { %426 = vmatprep.subr.mxu0 %v591_v0  ;;  %461 = vmatprep.subr.mxu1 %v591_v0  ;;  %v357_v55 = vld [vmem:[%s715_s4] ss:$0 sm:$0xff] }
  0x37   :  { %427 = vmatpush3.msra.mxu0 %v75_v15  ;;  %462 = vmatpush3.msra.mxu1 %v169_v20  ;;  %v358_v60 = vld [vmem:[%s717_s6] ss:$0 sm:$0xff] }
  0x38   :  { %428 = vmatprep.subr.mxu0 %v591_v0  ;;  %463 = vmatprep.subr.mxu1 %v591_v0 }
  0x39   :  { %429 = vmatpush3.msra.mxu0 %v74_v17  ;;  %464 = vmatpush3.msra.mxu1 %v168_v22 }
  0x3a   :  { %430 = vmatprep.subr.mxu0 %v591_v0  ;;  %465 = vmatprep.subr.mxu1 %v591_v0 }
  0x3b   :  { %431 = vmatpush3.msra.mxu0 %v73_v19  ;;  %466 = vmatpush3.msra.mxu1 %v167_v24 }
  0x3c   :  { %432 = vmatprep.subr.mxu0 %v591_v0  ;;  %467 = vmatprep.subr.mxu1 %v591_v0 }
  0x3d   :  { %433 = vmatpush3.msra.mxu0 %v72_v21  ;;  %468 = vmatpush3.msra.mxu1 %v166_v26 }
  0x3e   :  { %434 = vmatprep.subr.mxu0 %v591_v0  ;;  %469 = vmatprep.subr.mxu1 %v591_v0 }
  0x3f   :  { %435 = vmatpush3.msra.mxu0 %v71_v23  ;;  %470 = vmatpush3.msra.mxu1 %v165_v28 }
  0x40   :  { %436 = vmatprep.subr.mxu0 %v591_v0  ;;  %471 = vmatprep.subr.mxu1 %v591_v0 }
  0x41   :  { %437 = vmatpush3.msra.mxu0 %v70_v25  ;;  %472 = vmatpush3.msra.mxu1 %v164_v31 }
  0x42   :  { %438 = vmatprep.subr.mxu0 %v591_v0  ;;  %473 = vmatprep.subr.mxu1 %v591_v0 }
  0x43   :  { %439 = vmatpush3.msra.mxu0 %v69_v27  ;;  %474 = vmatpush3.msra.mxu1 %v163_v32 }
  0x44   :  { %440 = vmatprep.subr.mxu0 %v591_v0  ;;  %475 = vmatprep.subr.mxu1 %v591_v0 }
  0x45   :  { %441 = vmatpush3.msra.mxu0 %v68_v29  ;;  %476 = vmatpush3.msra.mxu1 %v162_v33 }
  0x46   :  { %443 = vmatmul.mubr.f32.vlgmr.msra.gmra.mxu0 %v67_v30  ;;  %480 = vmatprep.subr.mxu0 %v591_v0 }
  0x47   :  { %512 = vmatprep.mubr.msk.f32.mxu0 %vm592_vm0, %v591_v0  ;;  %481 = vmatpush3.msra.mxu0 %v271_v34 }
  0x48   :  { %482 = vmatprep.subr.mxu0 %v591_v0 }
  0x49   :  { %483 = vmatpush3.msra.mxu0 %v270_v35 }
  0x4a   :  { %484 = vmatprep.subr.mxu0 %v591_v0 }
  0x4b   :  { %485 = vmatpush3.msra.mxu0 %v269_v36 }
  0x4c   :  { %486 = vmatprep.subr.mxu0 %v591_v0 }
  0x4d   :  { %487 = vmatpush3.msra.mxu0 %v268_v37 }
  0x4e   :  { %488 = vmatprep.subr.mxu0 %v591_v0 }
  0x4f   :  { %489 = vmatpush3.msra.mxu0 %v267_v38 }
  0x50   :  { %490 = vmatprep.subr.mxu0 %v591_v0 }
  0x51   :  { %491 = vmatpush3.msra.mxu0 %v266_v39 }
  0x52   :  { %492 = vmatprep.subr.mxu0 %v591_v0 }
  0x53   :  { %493 = vmatpush3.msra.mxu0 %v265_v40 }
  0x54   :  { %494 = vmatprep.subr.mxu0 %v591_v0 }
  0x55   :  { %495 = vmatpush3.msra.mxu0 %v264_v41 }
  0x56   :  { %496 = vmatprep.subr.mxu0 %v591_v0 }
  0x57   :  { %497 = vmatpush3.msra.mxu0 %v263_v42 }
  0x58   :  { %498 = vmatprep.subr.mxu0 %v591_v0 }
  0x59   :  { %499 = vmatpush3.msra.mxu0 %v262_v43 }
  0x5a   :  { %500 = vmatprep.subr.mxu0 %v591_v0 }
  0x5b   :  { %501 = vmatpush3.msra.mxu0 %v261_v44 }
  0x5c   :  { %502 = vmatprep.subr.mxu0 %v591_v0 }
  0x5d   :  { %503 = vmatpush3.msra.mxu0 %v260_v45 }
  0x5e   :  { %504 = vmatprep.subr.mxu0 %v591_v0 }
  0x5f   :  { %505 = vmatpush3.msra.mxu0 %v259_v46 }
  0x60   :  { %506 = vmatprep.subr.mxu0 %v591_v0 }
  0x61   :  { %507 = vmatpush3.msra.mxu0 %v258_v52 }
  0x62   :  { %508 = vmatprep.subr.mxu0 %v591_v0 }
  0x63   :  { %509 = vmatpush3.msra.mxu0 %v257_v53 }
  0x64   :  { %510 = vmatprep.subr.mxu0 %v591_v0 }
  0x65   :  { %511 = vmatpush3.msra.mxu0 %v256_v54 }
 0x106   :  { %v157_v48 = vpop.f32.mrf.mxu0 }
 0x107   :  { %v158_v49 = vadd.f32 %v356_v47, %v157_v48 }
 0x108   :  { %v444_v50 = vpop.f32.mrf.mxu0 }
 0x109   :  { %v161_v51 = vmax.f32 %v158_v49, 0.0 }
 0x10b   :  { %478 = vmatmul.mubr.f32.vlgmr.msra.gmra.mxu1 %v161_v51 }
 0x1cb   :  { %v251_v56 = vpop.f32.mrf.mxu1 }
 0x1cc   :  { %v252_v57 = vadd.f32 %v357_v55, %v251_v56 }
 0x1cd   :  { %v479_v58 = vpop.f32.mrf.mxu1 }
 0x1ce   :  { %v255_v59 = vmax.f32 %v252_v57, 0.0 }
 0x1d0   :  { %513 = vmatmul.mubr.f32.vlgmr.msra.gmra.mxu0 %v255_v59 }
 0x290   :  { %v345_v61 = vpop.f32.mrf.mxu0 }
 0x291   :  { %v346_v62 = vadd.f32 %v358_v60, %v345_v61 }
 0x292   :  { %v514_v63 = vpop.f32.mrf.mxu0 }
 0x293   :  { %349 = vst [vmem:[%s718_s7] sm:$0xff] %v346_v62 }
 0x294   :  { %354 = vsyncpa [#allocation3], 1 }
 0x295   :  { %355 = vsyncpa [#allocation5], 1 }

</bundles_post_ra>
